<compile_context>
chip_gen: v7x
topology: tpu7x:2x2x1
jax: 0.10.0
libtpu: 0.0.40
codegen_flags: <defaults>
</compile_context>

<pallas_src>
import functools

import jax
import jax.numpy as jnp
import numpy as np
from jax.experimental import pallas as pl
from jax.experimental.pallas import tpu as pltpu


def _huber(x):
    # huber(x) = 0.5*x^2 if |x| < 1 else |x| - 0.5  (as used in the reference repo)
    ax = jnp.abs(x)
    return jnp.where(ax < 1.0, 0.5 * x * x, ax - 0.5)


def feasibility_kernel(NqT_ref, NtT_ref, lim_ref, qc_ref, tc_ref,
                       pack_out, loss_out):
    # Per grid step (R = block_batch * Dp rows, lane axis = time):
    #   NqT_ref : (K, 4T)  bf16   [N | dN | ddN | dddN]^T   (lane-stacked)
    #   NtT_ref : (Kt, 3T) bf16   [Nt | dNt | ddNt]^T
    #   lim_ref : (R, 3)   f32    per-row [qd_lim, qdd_lim, qddd_lim]
    #   qc_ref  : (R, K)   f32    control points, (batch*dof) on sublanes
    #   tc_ref  : (R, Kt)  f32    time control points, broadcast over dof rows
    #   pack_out: (R, 5T)  f32    [q | q_dot | q_ddot | q_dddot | dt]
    #   loss_out: (R, 3)   f32    [q_dot_loss, q_ddot_loss, q_dddot_loss]
    T = NtT_ref.shape[1] // 3

    qc = qc_ref[...].astype(jnp.bfloat16)
    tc = tc_ref[...].astype(jnp.bfloat16)

    # One fused MXU matmul per basis group (f32 accumulation).
    q_all = jnp.dot(qc, NqT_ref[...], preferred_element_type=jnp.float32)   # (R, 4T)
    t_all = jnp.dot(tc, NtT_ref[...], preferred_element_type=jnp.float32)   # (R, 3T)

    q           = q_all[:, 0 * T:1 * T]
    q_dot_tau   = q_all[:, 1 * T:2 * T]
    q_ddot_tau  = q_all[:, 2 * T:3 * T]
    q_dddot_tau = q_all[:, 3 * T:4 * T]

    dtau_dt     = t_all[:, 0 * T:1 * T]
    ddtau_dtt   = t_all[:, 1 * T:2 * T]
    dddtau_dttt = t_all[:, 2 * T:3 * T]

    dt = (1.0 / dtau_dt) * (1.0 / T)

    # Chain rule with CSE: reuse q_dot, dtau^2, dtau^3.
    dtau2 = dtau_dt * dtau_dt
    dtau3 = dtau2 * dtau_dt
    q_dot = q_dot_tau * dtau_dt
    q_ddot = q_ddot_tau * dtau2 + ddtau_dtt * q_dot
    q_dddot = (q_dddot_tau * dtau3
               + 3.0 * q_ddot_tau * ddtau_dtt * dtau2
               + q_dot * (dtau_dt * dddtau_dttt)
               + q_dot * (ddtau_dtt * ddtau_dtt))

    # Single lane-dense packed store for all time-major outputs.
    pack_out[...] = jnp.concatenate([q, q_dot, q_ddot, q_dddot, dt], axis=1)

    def limit_loss(val, k):
        lim = lim_ref[:, k:k + 1]                                # (R, 1)
        e = jnp.maximum(jnp.abs(val) - lim, 0.0)
        return jnp.sum(_huber(e) * dt, axis=1, keepdims=True)    # (R, 1)

    loss_out[...] = jnp.concatenate(
        [limit_loss(q_dot, 0), limit_loss(q_ddot, 1), limit_loss(q_dddot, 2)],
        axis=1)


def _pick_block_batch(B):
    # Amortize per-grid-step overhead while keeping >= 2 steps (v7x megacore).
    if B <= 2:
        return 1
    return int(min(16, max(1, B // 2)))


@jax.jit
def feasibility_forward(N, dN, ddN, dddN, Nt, dNt, ddNt,
                        q_dot_limits, q_ddot_limits, q_dddot_limits,
                        torque_limits, q_cps, t_cps):
    f32 = jnp.float32
    bf16 = jnp.bfloat16

    # Basis tensors carry a trivial leading axis (i == 1 in the torch einsum).
    N2, dN2, ddN2, dddN2 = N[0], dN[0], ddN[0], dddN[0]
    Nt2, dNt2, ddNt2 = Nt[0], dNt[0], ddNt[0]

    B, K, D = q_cps.shape
    T = N2.shape[0]
    Kt = Nt2.shape[1]

    Dp = ((D + 7) // 8) * 8            # pad dof axis to a full sublane group
    Bb = _pick_block_batch(B)          # batches per grid step
    Bp = ((B + Bb - 1) // Bb) * Bb     # padded batch count
    R = Bb * Dp                        # rows per grid step

    # ---- one-shot XLA-side layout prep (tiny) ------------------------------
    NqT = jnp.concatenate([N2, dN2, ddN2, dddN2], axis=0).T.astype(bf16)   # (K, 4T)
    NtT = jnp.concatenate([Nt2, dNt2, ddNt2], axis=0).T.astype(bf16)       # (Kt, 3T)

    qcT = jnp.swapaxes(q_cps, 1, 2)                                        # (B, D, K)
    qcT = jnp.pad(qcT, ((0, 0), (0, Dp - D), (0, 0)))                      # zero pad dofs
    qcT = jnp.pad(qcT, ((0, Bp - B), (0, 0), (0, 0)), mode='edge')         # pad batch
    qc_flat = qcT.reshape(Bp * Dp, K).astype(f32)

    tc = t_cps[..., 0]                                                     # (B, Kt)
    tc_exp = jnp.broadcast_to(tc[:, None, :], (B, Dp, Kt))
    tc_exp = jnp.pad(tc_exp, ((0, Bp - B), (0, 0), (0, 0)), mode='edge')
    tc_flat = tc_exp.reshape(Bp * Dp, Kt).astype(f32)

    lim = jnp.concatenate([q_dot_limits, q_ddot_limits, q_dddot_limits], axis=0).T  # (D, 3)
    lim = jnp.pad(lim, ((0, Dp - D), (0, 0)), constant_values=1.0)
    lim_tile = jnp.tile(lim, (Bb, 1)).astype(f32)                          # (R, 3)

    grid = (Bp // Bb,)

    packed, losses = pl.pallas_call(
        feasibility_kernel,
        out_shape=(jax.ShapeDtypeStruct((Bp * Dp, 5 * T), f32),
                   jax.ShapeDtypeStruct((Bp * Dp, 3), f32)),
        grid_spec=pltpu.PrefetchScalarGridSpec(
            num_scalar_prefetch=0,
            grid=grid,
            in_specs=[
                pl.BlockSpec((K, 4 * T), lambda i: (0, 0)),
                pl.BlockSpec((Kt, 3 * T), lambda i: (0, 0)),
                pl.BlockSpec((R, 3), lambda i: (0, 0)),
                pl.BlockSpec((R, K), lambda i: (i, 0)),
                pl.BlockSpec((R, Kt), lambda i: (i, 0)),
            ],
            out_specs=(
                pl.BlockSpec((R, 5 * T), lambda i: (i, 0)),
                pl.BlockSpec((R, 3), lambda i: (i, 0)),
            ),
        ),
        compiler_params=pltpu.CompilerParams(
            dimension_semantics=("parallel",)),
    )(NqT, NtT, lim_tile, qc_flat, tc_flat)

    # ---- cheap XLA-side unpack / finalize ----------------------------------
    pk = packed.reshape(Bp, Dp, 5, T)[:B]                 # (B, Dp, 5, T)
    q       = jnp.transpose(pk[:, :D, 0, :], (0, 2, 1))   # (B, T, D)
    q_dot   = jnp.transpose(pk[:, :D, 1, :], (0, 2, 1))
    q_ddot  = jnp.transpose(pk[:, :D, 2, :], (0, 2, 1))
    q_dddot = jnp.transpose(pk[:, :D, 3, :], (0, 2, 1))
    dt      = pk[:, 0, 4, :]                              # (B, T)

    t_cumsum = jnp.cumsum(dt, axis=-1)
    t = jnp.sum(dt, axis=-1)

    ls = losses.reshape(Bp, Dp, 3)[:B, :D]                # (B, D, 3)
    q_dot_loss   = ls[:, :, 0]
    q_ddot_loss  = ls[:, :, 1]
    q_dddot_loss = ls[:, :, 2]

    # TODO(synk): RNEA torque (pinocchio) not representable in Pallas; the reference
    # forward returns zeros, so torque / torque_loss are exact zeros here.
    torque = jnp.zeros((B, T, D), f32)
    torque_loss = jnp.zeros((B, D), f32)

    model_loss = jnp.sum(q_dot_loss) + jnp.sum(q_ddot_loss) + jnp.sum(q_dddot_loss)
    return (model_loss, q_dot_loss, q_ddot_loss, q_dddot_loss, torque_loss,
            q, q_dot, q_ddot, q_dddot, torque, t, t_cumsum, dt)


def feasibility_reference(N, dN, ddN, dddN, Nt, dNt, ddNt,
                          q_dot_limits, q_ddot_limits, q_dddot_limits,
                          torque_limits, q_cps, t_cps):
    """Pure-JAX mirror of the PyTorch forward, using the same matmul precision
    (bf16 MXU operands, f32 accumulation) as the kernel."""
    bf16 = jnp.bfloat16
    ein = functools.partial(jnp.einsum, preferred_element_type=jnp.float32)
    qc = q_cps.astype(bf16)
    tc = t_cps.astype(bf16)
    q           = ein('ijk,lkm->ljm', N.astype(bf16), qc)
    q_dot_tau   = ein('ijk,lkm->ljm', dN.astype(bf16), qc)
    q_ddot_tau  = ein('ijk,lkm->ljm', ddN.astype(bf16), qc)
    q_dddot_tau = ein('ijk,lkm->ljm', dddN.astype(bf16), qc)
    dtau_dt     = ein('ijk,lkm->ljm', Nt.astype(bf16), tc)
    ddtau_dtt   = ein('ijk,lkm->ljm', dNt.astype(bf16), tc)
    dddtau_dttt = ein('ijk,lkm->ljm', ddNt.astype(bf16), tc)
    dt = 1.0 / dtau_dt[..., 0] / dtau_dt.shape[1]
    t_cumsum = jnp.cumsum(dt, axis=-1)
    t = jnp.sum(dt, axis=-1)
    dtau2 = dtau_dt ** 2
    q_dot = q_dot_tau * dtau_dt
    q_ddot = q_ddot_tau * dtau2 + ddtau_dtt * q_dot_tau * dtau_dt
    q_dddot = (q_dddot_tau * dtau_dt ** 3 + 3 * q_ddot_tau * ddtau_dtt * dtau2
               + q_dot_tau * dtau2 * dddtau_dttt
               + q_dot_tau * ddtau_dtt ** 2 * dtau_dt)
    torque = jnp.zeros_like(q)

    def ll(v, lim):
        e = jnp.maximum(jnp.abs(v) - lim, 0.0)
        return jnp.sum(_huber(e) * dt[..., None], axis=1)

    q_dot_loss = ll(q_dot, q_dot_limits)
    q_ddot_loss = ll(q_ddot, q_ddot_limits)
    q_dddot_loss = ll(q_dddot, q_dddot_limits)
    torque_loss = ll(torque, torque_limits)
    model_loss = jnp.sum(jnp.concatenate(
        [q_dot_loss, q_ddot_loss, q_dddot_loss], axis=-1))
    return (model_loss, q_dot_loss, q_ddot_loss, q_dddot_loss, torque_loss,
            q, q_dot, q_ddot, q_dddot, torque, t, t_cumsum, dt)


if __name__ == "__main__":
    B, T, K, Kt, D = 2, 64, 16, 16, 7   # batch, time knots, ctrl pts, time ctrl pts, dof
    key = jax.random.PRNGKey(0)
    ks = jax.random.split(key, 9)
    f32 = jnp.float32

    # deterministic synthetic B-spline basis matrices (module takes them from bsp / bsp_t)
    N = jax.random.normal(ks[0], (1, T, K), f32)
    dN = jax.random.normal(ks[1], (1, T, K), f32)
    ddN = jax.random.normal(ks[2], (1, T, K), f32)
    dddN = jax.random.normal(ks[3], (1, T, K), f32)
    Nt = jnp.abs(jax.random.normal(ks[4], (1, T, Kt), f32)) + 0.1   # keep dtau/dt > 0
    dNt = jax.random.normal(ks[5], (1, T, Kt), f32)
    ddNt = jax.random.normal(ks[6], (1, T, Kt), f32)

    q_cps = jax.random.normal(ks[7], (B, K, D), f32)
    t_cps = jnp.abs(jax.random.normal(ks[8], (B, Kt, 1), f32)) + 0.5

    # iiwa-like limits, shape (1, D) so they broadcast over (B, T, D)
    q_dot_limits = jnp.array([[1.48, 1.48, 1.75, 1.31, 2.27, 2.36, 2.36]], f32)
    q_ddot_limits = 10.0 * q_dot_limits
    q_dddot_limits = 100.0 * q_dot_limits
    torque_limits = jnp.array([[320., 320., 176., 176., 110., 40., 40.]], f32)

    args = (N, dN, ddN, dddN, Nt, dNt, ddNt,
            q_dot_limits, q_ddot_limits, q_dddot_limits, torque_limits,
            q_cps, t_cps)

    outs = jax.block_until_ready(feasibility_forward(*args))
    refs = jax.block_until_ready(feasibility_reference(*args))

    names = ("model_loss", "q_dot_loss", "q_ddot_loss", "q_dddot_loss",
             "torque_loss", "q", "q_dot", "q_ddot", "q_dddot", "torque",
             "t", "t_cumsum", "dt")
    for name, o, r in zip(names, outs, refs):
        o = np.asarray(o)
        r = np.asarray(r)
        scale = float(np.max(np.abs(r))) if r.size else 0.0
        np.testing.assert_allclose(o, r, rtol=2e-3, atol=1e-5 * max(1.0, scale),
                                   err_msg=name)

    print("KERNEL_OK")
</pallas_src>

<mosaic_0001>
module attributes {stable_mosaic.version = 11 : i64} {
  func.func @feasibility_kernel(%arg0: i32, %arg1: memref<16x256xbf16, #tpu.memory_space<vmem>>, %arg2: memref<16x192xbf16, #tpu.memory_space<vmem>>, %arg3: memref<8x3xf32, #tpu.memory_space<vmem>>, %arg4: memref<8x16xf32, #tpu.memory_space<vmem>>, %arg5: memref<8x16xf32, #tpu.memory_space<vmem>>, %arg6: memref<8x320xf32, #tpu.memory_space<vmem>>, %arg7: memref<8x3xf32, #tpu.memory_space<vmem>>) attributes {dimension_semantics = [#tpu.dimension_semantics<parallel>], iteration_bounds = array<i64: 2>, scalar_prefetch = 0 : i64, scratch_operands = 0 : i64, tpu.core_type = #tpu.core_type<tc>, window_params = [{pipeline_mode = #tpu.pipeline_mode<synchronous>, transform_indices = @transform_0, window_bounds = array<i64: 16, 256>}, {pipeline_mode = #tpu.pipeline_mode<synchronous>, transform_indices = @transform_1, window_bounds = array<i64: 16, 192>}, {pipeline_mode = #tpu.pipeline_mode<synchronous>, transform_indices = @transform_2, window_bounds = array<i64: 8, 3>}, {transform_indices = @transform_3, window_bounds = array<i64: 8, 16>}, {transform_indices = @transform_4, window_bounds = array<i64: 8, 16>}, {transform_indices = @transform_5, window_bounds = array<i64: 8, 320>}, {transform_indices = @transform_6, window_bounds = array<i64: 8, 3>}]} {
    %c0 = arith.constant 0 : index
    %c0_0 = arith.constant 0 : index
    %0 = vector.load %arg4[%c0, %c0_0] : memref<8x16xf32, #tpu.memory_space<vmem>>, vector<8x16xf32>
    %1 = arith.truncf %0 : vector<8x16xf32> to vector<8x16xbf16>
    %c0_1 = arith.constant 0 : index
    %c0_2 = arith.constant 0 : index
    %2 = vector.load %arg5[%c0_1, %c0_2] : memref<8x16xf32, #tpu.memory_space<vmem>>, vector<8x16xf32>
    %3 = arith.truncf %2 : vector<8x16xf32> to vector<8x16xbf16>
    %c0_3 = arith.constant 0 : index
    %c0_4 = arith.constant 0 : index
    %4 = vector.load %arg1[%c0_3, %c0_4] : memref<16x256xbf16, #tpu.memory_space<vmem>>, vector<16x256xbf16>
    %cst = arith.constant dense<0.000000e+00> : vector<8x256xf32>
    %5 = tpu.matmul %1, %4, %cst {dimension_numbers = #tpu.dot_dimension_numbers<[1], [0], [0], [1], [0, 0, 1, 1], [], []>} : vector<8x16xbf16>, vector<16x256xbf16>, vector<8x256xf32> -> vector<8x256xf32>
    %c0_5 = arith.constant 0 : index
    %c0_6 = arith.constant 0 : index
    %6 = vector.load %arg2[%c0_5, %c0_6] : memref<16x192xbf16, #tpu.memory_space<vmem>>, vector<16x192xbf16>
    %cst_7 = arith.constant dense<0.000000e+00> : vector<8x192xf32>
    %7 = tpu.matmul %3, %6, %cst_7 {dimension_numbers = #tpu.dot_dimension_numbers<[1], [0], [0], [1], [0, 0, 1, 1], [], []>} : vector<8x16xbf16>, vector<16x192xbf16>, vector<8x192xf32> -> vector<8x192xf32>
    %8 = vector.extract_strided_slice %5 {offsets = [0, 0], sizes = [8, 64], strides = [1, 1]} : vector<8x256xf32> to vector<8x64xf32>
    %9 = vector.extract_strided_slice %5 {offsets = [0, 64], sizes = [8, 64], strides = [1, 1]} : vector<8x256xf32> to vector<8x64xf32>
    %10 = vector.extract_strided_slice %5 {offsets = [0, 128], sizes = [8, 64], strides = [1, 1]} : vector<8x256xf32> to vector<8x64xf32>
    %11 = vector.extract_strided_slice %5 {offsets = [0, 192], sizes = [8, 64], strides = [1, 1]} : vector<8x256xf32> to vector<8x64xf32>
    %12 = vector.extract_strided_slice %7 {offsets = [0, 0], sizes = [8, 64], strides = [1, 1]} : vector<8x192xf32> to vector<8x64xf32>
    %13 = vector.extract_strided_slice %7 {offsets = [0, 64], sizes = [8, 64], strides = [1, 1]} : vector<8x192xf32> to vector<8x64xf32>
    %14 = vector.extract_strided_slice %7 {offsets = [0, 128], sizes = [8, 64], strides = [1, 1]} : vector<8x192xf32> to vector<8x64xf32>
    %cst_8 = arith.constant 1.000000e+00 : f32
    %15 = vector.broadcast %cst_8 : f32 to vector<8x64xf32>
    %16 = arith.divf %15, %12 : vector<8x64xf32>
    %cst_9 = arith.constant 1.562500e-02 : f32
    %17 = vector.broadcast %cst_9 : f32 to vector<8x64xf32>
    %18 = arith.mulf %16, %17 : vector<8x64xf32>
    %19 = arith.mulf %12, %12 : vector<8x64xf32>
    %20 = arith.mulf %19, %12 : vector<8x64xf32>
    %21 = arith.mulf %9, %12 : vector<8x64xf32>
    %22 = arith.mulf %10, %19 : vector<8x64xf32>
    %23 = arith.mulf %13, %21 : vector<8x64xf32>
    %24 = arith.addf %22, %23 : vector<8x64xf32>
    %25 = arith.mulf %11, %20 : vector<8x64xf32>
    %cst_10 = arith.constant 3.000000e+00 : f32
    %26 = vector.broadcast %cst_10 : f32 to vector<8x64xf32>
    %27 = arith.mulf %26, %10 : vector<8x64xf32>
    %28 = arith.mulf %27, %13 : vector<8x64xf32>
    %29 = arith.mulf %28, %19 : vector<8x64xf32>
    %30 = arith.addf %25, %29 : vector<8x64xf32>
    %31 = arith.mulf %12, %14 : vector<8x64xf32>
    %32 = arith.mulf %21, %31 : vector<8x64xf32>
    %33 = arith.addf %30, %32 : vector<8x64xf32>
    %34 = arith.mulf %13, %13 : vector<8x64xf32>
    %35 = arith.mulf %21, %34 : vector<8x64xf32>
    %36 = arith.addf %33, %35 : vector<8x64xf32>
    %37 = tpu.concatenate %8, %21, %24, %36, %18 in 1 : vector<8x64xf32>, vector<8x64xf32>, vector<8x64xf32>, vector<8x64xf32>, vector<8x64xf32> -> vector<8x320xf32>
    %c0_11 = arith.constant 0 : index
    %c0_12 = arith.constant 0 : index
    %38 = vector.load %arg6[%c0_11, %c0_12] : memref<8x320xf32, #tpu.memory_space<vmem>>, vector<8x320xf32>
    tpu.vector_store %arg6[%c0_11, %c0_12], %37 {strides = array<i32>} : memref<8x320xf32, #tpu.memory_space<vmem>>, vector<8x320xf32>,
    %c0_13 = arith.constant 0 : index
    %c0_14 = arith.constant 0 : index
    %39 = vector.load %arg3[%c0_13, %c0_14] : memref<8x3xf32, #tpu.memory_space<vmem>>, vector<8x1xf32>
    %40 = math.absf %21 : vector<8x64xf32>
    %41 = vector.broadcast %39 : vector<8x1xf32> to vector<8x64xf32>
    %42 = arith.subf %40, %41 : vector<8x64xf32>
    %cst_15 = arith.constant 0.000000e+00 : f32
    %43 = vector.broadcast %cst_15 : f32 to vector<8x64xf32>
    %44 = arith.maximumf %42, %43 : vector<8x64xf32>
    %45 = math.absf %44 : vector<8x64xf32>
    %cst_16 = arith.constant 1.000000e+00 : f32
    %46 = vector.broadcast %cst_16 : f32 to vector<8x64xf32>
    %47 = arith.cmpf olt, %45, %46 : vector<8x64xf32>
    %cst_17 = arith.constant 5.000000e-01 : f32
    %48 = vector.broadcast %cst_17 : f32 to vector<8x64xf32>
    %49 = arith.mulf %48, %44 : vector<8x64xf32>
    %50 = arith.mulf %49, %44 : vector<8x64xf32>
    %cst_18 = arith.constant 5.000000e-01 : f32
    %51 = vector.broadcast %cst_18 : f32 to vector<8x64xf32>
    %52 = arith.subf %45, %51 : vector<8x64xf32>
    %53 = arith.select %47, %50, %52 : vector<8x64xi1>, vector<8x64xf32>
    %54 = arith.mulf %53, %18 : vector<8x64xf32>
    %cst_19 = arith.constant dense<0.000000e+00> : vector<8xf32>
    %55 = vector.multi_reduction <add>, %54, %cst_19 [1] : vector<8x64xf32> to vector<8xf32>
    %56 = vector.shape_cast %55 : vector<8xf32> to vector<8x1xf32>
    %c0_20 = arith.constant 0 : index
    %c1 = arith.constant 1 : index
    %57 = vector.load %arg3[%c0_20, %c1] : memref<8x3xf32, #tpu.memory_space<vmem>>, vector<8x1xf32>
    %58 = math.absf %24 : vector<8x64xf32>
    %59 = vector.broadcast %57 : vector<8x1xf32> to vector<8x64xf32>
    %60 = arith.subf %58, %59 : vector<8x64xf32>
    %cst_21 = arith.constant 0.000000e+00 : f32
    %61 = vector.broadcast %cst_21 : f32 to vector<8x64xf32>
    %62 = arith.maximumf %60, %61 : vector<8x64xf32>
    %63 = math.absf %62 : vector<8x64xf32>
    %cst_22 = arith.constant 1.000000e+00 : f32
    %64 = vector.broadcast %cst_22 : f32 to vector<8x64xf32>
    %65 = arith.cmpf olt, %63, %64 : vector<8x64xf32>
    %cst_23 = arith.constant 5.000000e-01 : f32
    %66 = vector.broadcast %cst_23 : f32 to vector<8x64xf32>
    %67 = arith.mulf %66, %62 : vector<8x64xf32>
    %68 = arith.mulf %67, %62 : vector<8x64xf32>
    %cst_24 = arith.constant 5.000000e-01 : f32
    %69 = vector.broadcast %cst_24 : f32 to vector<8x64xf32>
    %70 = arith.subf %63, %69 : vector<8x64xf32>
    %71 = arith.select %65, %68, %70 : vector<8x64xi1>, vector<8x64xf32>
    %72 = arith.mulf %71, %18 : vector<8x64xf32>
    %cst_25 = arith.constant dense<0.000000e+00> : vector<8xf32>
    %73 = vector.multi_reduction <add>, %72, %cst_25 [1] : vector<8x64xf32> to vector<8xf32>
    %74 = vector.shape_cast %73 : vector<8xf32> to vector<8x1xf32>
    %c0_26 = arith.constant 0 : index
    %c2 = arith.constant 2 : index
    %75 = vector.load %arg3[%c0_26, %c2] : memref<8x3xf32, #tpu.memory_space<vmem>>, vector<8x1xf32>
    %76 = math.absf %36 : vector<8x64xf32>
    %77 = vector.broadcast %75 : vector<8x1xf32> to vector<8x64xf32>
    %78 = arith.subf %76, %77 : vector<8x64xf32>
    %cst_27 = arith.constant 0.000000e+00 : f32
    %79 = vector.broadcast %cst_27 : f32 to vector<8x64xf32>
    %80 = arith.maximumf %78, %79 : vector<8x64xf32>
    %81 = math.absf %80 : vector<8x64xf32>
    %cst_28 = arith.constant 1.000000e+00 : f32
    %82 = vector.broadcast %cst_28 : f32 to vector<8x64xf32>
    %83 = arith.cmpf olt, %81, %82 : vector<8x64xf32>
    %cst_29 = arith.constant 5.000000e-01 : f32
    %84 = vector.broadcast %cst_29 : f32 to vector<8x64xf32>
    %85 = arith.mulf %84, %80 : vector<8x64xf32>
    %86 = arith.mulf %85, %80 : vector<8x64xf32>
    %cst_30 = arith.constant 5.000000e-01 : f32
    %87 = vector.broadcast %cst_30 : f32 to vector<8x64xf32>
    %88 = arith.subf %81, %87 : vector<8x64xf32>
    %89 = arith.select %83, %86, %88 : vector<8x64xi1>, vector<8x64xf32>
    %90 = arith.mulf %89, %18 : vector<8x64xf32>
    %cst_31 = arith.constant dense<0.000000e+00> : vector<8xf32>
    %91 = vector.multi_reduction <add>, %90, %cst_31 [1] : vector<8x64xf32> to vector<8xf32>
    %92 = vector.shape_cast %91 : vector<8xf32> to vector<8x1xf32>
    %93 = tpu.concatenate %56, %74, %92 in 1 : vector<8x1xf32>, vector<8x1xf32>, vector<8x1xf32> -> vector<8x3xf32>
    %c0_32 = arith.constant 0 : index
    %c0_33 = arith.constant 0 : index
    %94 = vector.load %arg7[%c0_32, %c0_33] : memref<8x3xf32, #tpu.memory_space<vmem>>, vector<8x3xf32>
    tpu.vector_store %arg7[%c0_32, %c0_33], %93 {strides = array<i32>} : memref<8x3xf32, #tpu.memory_space<vmem>>, vector<8x3xf32>,
    return
  }
  func.func @transform_0(%arg0: i32) -> (i32, i32) {
    %c0_i32 = arith.constant 0 : i32
    %c0_i32_0 = arith.constant 0 : i32
    %c0_i32_1 = arith.constant 0 : i32
    return %c0_i32, %c0_i32_0 : i32, i32
  }
  func.func @transform_1(%arg0: i32) -> (i32, i32) {
    %c0_i32 = arith.constant 0 : i32
    %c0_i32_0 = arith.constant 0 : i32
    %c0_i32_1 = arith.constant 0 : i32
    return %c0_i32, %c0_i32_0 : i32, i32
  }
  func.func @transform_2(%arg0: i32) -> (i32, i32) {
    %c0_i32 = arith.constant 0 : i32
    %c0_i32_0 = arith.constant 0 : i32
    %c0_i32_1 = arith.constant 0 : i32
    return %c0_i32, %c0_i32_0 : i32, i32
  }
  func.func @transform_3(%arg0: i32) -> (i32, i32) {
    %c0_i32 = arith.constant 0 : i32
    %c0_i32_0 = arith.constant 0 : i32
    return %arg0, %c0_i32 : i32, i32
  }
  func.func @transform_4(%arg0: i32) -> (i32, i32) {
    %c0_i32 = arith.constant 0 : i32
    %c0_i32_0 = arith.constant 0 : i32
    return %arg0, %c0_i32 : i32, i32
  }
  func.func @transform_5(%arg0: i32) -> (i32, i32) {
    %c0_i32 = arith.constant 0 : i32
    %c0_i32_0 = arith.constant 0 : i32
    return %arg0, %c0_i32 : i32, i32
  }
  func.func @transform_6(%arg0: i32) -> (i32, i32) {
    %c0_i32 = arith.constant 0 : i32
    %c0_i32_0 = arith.constant 0 : i32
    return %arg0, %c0_i32 : i32, i32
  }
}

</mosaic_0001>

<bundles_post_ra>
// kernel: feasibility_forward.1
= control target key start
LH: loop header
LB: loop body
LE: loop exit
PB: predicated region body
PF: predicated region fallthrough
CT: control target
= control target key end

     0   :  { %s701_s21 = smov 0   ;;  %s783_s0 = inlined_call_operand.vmem [shape: bf16[16,256], index: 0, kind: input, shape index: {}]   ;;  %s784_s1 = inlined_call_operand.vmem [shape: bf16[16,192], index: 1, kind: input, shape index: {}]   ;;  %s785_s2 = inlined_call_operand.vmem [shape: f32[8,3], index: 2, kind: input, shape index: {}]   ;;  %s786_s3 = inlined_call_operand.vmem [shape: f32[16,16], index: 3, kind: input, shape index: {}]   ;;  %s787_s4 = inlined_call_operand.vmem [shape: f32[16,16], index: 4, kind: input, shape index: {}]   ;;  %s788_s5 = inlined_call_operand.vmem [shape: f32[16,320], index: 5, kind: output, shape index: {0}]   ;;  %s789_s6 = inlined_call_operand.vmem [shape: f32[16,3], index: 6, kind: output, shape index: {1}]  }
   0x1 LB: > { %s609_s22 = sadd.s32 4294967295, %s660_s21   ;;  %p613_p0 = scmp.ge.s32.totalorder %s660_s21, 1  ;;  %s660_s21 = sphi %s701_s21, %s17_s21  }
   0x2   : > { %p223_p1 = scmp.lt.s32.totalorder %s660_s21, 3 }
   0x4   : > { %p224_p2 = pnand %p613_p0, %p223_p1 }
   0x5   : > { %v646_v0 = vld [vmem:[%s784_s1 + $0x4] ss:$8 sps:$4 sm:$0xff] (!%p224_p2)   ;;  %p260_p3 = scmp.lt.s32.totalorder (!%p224_p2), %s609_s22, 1  ;;  %v662_v2 = vmov (!%p224_p2), 0   ;;  %v650_v3 = vld [vmem:[%s784_s1] ss:$8 sps:$4 sm:$0xff] (!%p224_p2)  }
   0x6   : > { %227 = sbr.rel (%p224_p2) target bundleno = 753 (0x2f1), region = 40  ;;  %v648_v1 = vld [vmem:[%s783_s0 + $0x4] ss:$8 sps:$4 sm:$0xff] (!%p224_p2)   ;;  %386 = vmatprep.mubr.bf16.mxu1 (!%p224_p2), %v662_v2  ;;  %330 = vmatprep.mubr.bf16.mxu0 (!%p224_p2), %v662_v2  ;;  %v651_v4 = vld [vmem:[%s783_s0] ss:$8 sps:$4 sm:$0xff] (!%p224_p2)   ;;  %vm294_vm0 = vcmask (!%p224_p2), 130048  }
   0x7   : > { %354 = vmatprep.subr.bf16.mxu1 (!%p224_p2), %v646_v0  ;;  %642 = vset.pattern.permute.xlu0 (!%p224_p2), %v662_v2  ;;  %v663_v9 = vmov (!%p224_p2), 2   ;;  %s664_s14 = smov (!%p224_p2), 64   ;;  %v440_v21 = vld [vmem:[%s785_s2] sm:$0xff] (!%p224_p2)  ;;  %vm434_vm1 = vcmask (!%p224_p2), 523264   ;;  %v665_v24 = vmov (!%p224_p2), 1   ;;  %vm505_vm5 = vcmask (!%p224_p2), 7168  }
   0x8   : > { %298 = vmatprep.subr.bf16.mxu0 (!%p224_p2), %v648_v1  ;;  %355 = vmatpush1.bf16.msra.mxu1 (!%p224_p2), %v650_v3  ;;  %vm507_vm6 = vcmask (!%p224_p2), 15360   ;;  %vm509_vm7 = vcmask (!%p224_p2), 23552  }
   0x9   : > { %299 = vmatpush1.bf16.msra.mxu0 (!%p224_p2), %v651_v4  ;;  %643 = vset.pattern.permute.xlu1 (!%p224_p2), %v663_v9 }
   0xd   : > { %s791_s22 = smov (!%p260_p3, %s609_s22), 1 }
   0xe   : > { %s724_s7 = sshll.u32 %s791_s22, 3  ;;  %s629_s17 = smul.u32 24, %s791_s22 }
   0xf   : > { %s267_s10 = scalar_lea.vmem %s787_s4, %s724_s7  ;;  %s263_s13 = scalar_lea.vmem %s786_s3, %s724_s7 }
  0x10   : > { %v280_v5 = vld [vmem:[%s267_s10] sm:$0xff]  ;;  %s749_s20 = scalar_lea.vmem %s788_s5, %s629_s17  ;;  %s276_s24 = scalar_lea.vmem %s789_s6, %s724_s7 }
  0x11   : > { %v278_v6 = vld [vmem:[%s263_s13] sm:$0xff]  ;;  %v281_v7 = vpack.c.bf16 %v280_v5, %v280_v5 }
  0x12   : > { %v279_v8 = vpack.c.bf16 %v278_v6, %v278_v6 }
  0x13   : > { %623 = vmatmul.mubr.msk.bf16.vlgmr.msra.gmra.mrb[0].mxu1 %vm294_vm0, %v281_v7 }
  0x14   : > { %620 = vmatmul.mubr.msk.bf16.vlgmr.msra.gmra.mrb[0].mxu0 %vm294_vm0, %v279_v8 }
  0xe6   : > { %v388_v10 = vpop.f32.mrb[0].mxu1 }
  0xe7   : > { %v332_v11 = vpop.f32.mrb[0].mxu0  ;;  %v734_v12 = vmul.f32 %v388_v10, %v388_v10  ;;  %401 = vrot.lane.b32.xlu0 %v388_v10, %s664_s14  ;;  %v390_v13 = vpop.f32.mrb[1].mxu1  ;;  %652 = vrcp.f32 %v388_v10 }
  0xe8   : > { %v737_v14 = vpop.f32.mrb[1].mxu0  ;;  %v425_v15 = vmul.f32 %v390_v13, %v388_v10  ;;  %v392_v16 = vpop.f32.mrb[2].mxu1 }
  0xe9   : > { %v336_v17 = vpop.f32.mrb[2].mxu0  ;;  %v393_v18 = vpop.f32.mrb[3].mxu1  ;;  %v399_v19 = vmul.f32 %v734_v12, %v388_v10  ;;  %v417_v25 = vmul.f32 3.0, %v737_v14  ;;  %v405_v60 = vmul.f32 %v734_v12, %v737_v14 }
  0xea   : > { %v337_v20 = vpop.f32.mrb[3].mxu0  ;;  %427 = vrot.lane.b32.xlu1 %v425_v15, %s664_s14 }
  0xeb   : > { %413 = vrot.lane.b32.xlu0 %v399_v19, %s664_s14 }
  0xef   : > { %444 = vperm.xlu0 %642, %v440_v21  }
  0xf1   : > { %v653_v22 = vpop.eup %652 }
  0xf2   : > { %v751_v23 = vmul.f32 0.015625, %v653_v22 }
  0xf3   : > { %644 = vset.pattern.permute.xlu0 %v665_v24 }
  0xf4   : > { %469 = vperm.xlu0 %644, %v440_v21   ;;  %439 = vst.msk [vmem:[%s749_s20 + $0x10] sm:$0xff] %vm434_vm1, %v751_v23 }
  0xf8   : > { %645 = vset.pattern.permute.xlu0 %v663_v9 }
 0x159   : > { %v402_v26 = vpop.permute.xlu0 %401 }
 0x15a   : > { %v404_v27 = vmul.f32 %v402_v26, %v332_v11  ;;  %v418_v28 = vmul.f32 %v417_v25, %v402_v26 }
 0x15c   : > { %v419_v29 = vmul.f32 %v418_v28, %v734_v12  ;;  %v406_v30 = vmul.f32 %v404_v27, %v388_v10  ;;  %v435_v31 = vsel %vm434_vm1, %v332_v11, %v404_v27  ;;  %v428_v32 = vpop.permute.xlu1 %427  ;;  %v441_v39 = vand.u32 2147483647, %v404_v27 }
 0x15d   : > { %437 = vst [vmem:[%s749_s20] sm:$0xff] %v435_v31  ;;  %v414_v33 = vpop.permute.xlu0 %413  ;;  %v430_v36 = vmul.f32 %v428_v32, %v404_v27  ;;  %v432_v41 = vmul.f32 %v404_v27, %v734_v12 }
 0x15e   : > { %421 = vrot.lane.b32.xlu1 %v419_v29, %s664_s14  ;;  %v416_v34 = vmul.f32 %v414_v33, %v737_v14 }
 0x162   : > { %486 = vperm.xlu1 %643, %v440_v21  }
 0x166   : > { %456 = vrot.lane.b32.xlu1 %v751_v23, %s664_s14 }
 0x16a   : > { %408 = vrot.lane.b32.xlu1 %v406_v30, %s664_s14 }
 0x16e   : > { %v445_v38 = vpop.permute.xlu0 %444 }
 0x16f   : > { %v447_v42 = vsub.f32 %v441_v39, %v445_v38 }
 0x171   : > { %v448_v44 = vmax.f32 %v447_v42, 0.0 }
 0x173   : > { %v449_v45 = vand.u32 2147483647, %v448_v44  ;;  %v451_v46 = vmul.f32 0.5, %v448_v44  ;;  %v470_v3 = vpop.permute.xlu0 %469 }
 0x175   : > { %v452_v48 = vmul.f32 %v451_v46, %v448_v44  ;;  %v624_v50 = vadd.f32 -0.5, %v449_v45  ;;  %vm450_vm2 = vcmp.lt.f32.partialorder %v449_v45, 1.0 }
 0x177   : > { %v454_v53 = vsel %vm450_vm2, %v452_v48, %v624_v50 }
 0x1d0   : > { %v422_v35 = vpop.permute.xlu1 %421 }
 0x1d1   : > { %v424_v37 = vadd.f32 %v422_v35, %v416_v34 }
 0x1d3   : > { %v431_v40 = vadd.f32 %v430_v36, %v424_v37 }
 0x1d5   : > { %v433_v43 = vadd.f32 %v432_v41, %v431_v40 }
 0x1d7   : > { %v484_v47 = vand.u32 2147483647, %v433_v43 }
 0x1e1   : > { %v487_v49 = vpop.permute.xlu1 %486 }
 0x1e2   : > { %v489_v51 = vsub.f32 %v484_v47, %v487_v49 }
 0x1e4   : > { %v490_v52 = vmax.f32 %v489_v51, 0.0 }
 0x1e5   : > { %v457_v54 = vpop.permute.xlu1 %456 }
 0x1e6   : > { %v491_v55 = vand.u32 2147483647, %v490_v52  ;;  %v493_v56 = vmul.f32 0.5, %v490_v52  ;;  %v459_v57 = vmul.f32 %v457_v54, %v454_v53 }
 0x1e8   : > { %v494_v58 = vmul.f32 %v493_v56, %v490_v52  ;;  %vm492_vm3 = vcmp.lt.f32.partialorder %v491_v55, 1.0  ;;  %v626_v59 = vadd.f32 -0.5, %v491_v55  ;;  %461 = vrot.lane.b32.xlu1 %v459_v57, %s664_s14 }
 0x1e9   : > { %v409_v61 = vpop.permute.xlu1 %408 }
 0x1ea   : > { %v496_v62 = vsel %vm492_vm3, %v494_v58, %v626_v59  ;;  %v411_v63 = vadd.f32 %v409_v61, %v405_v60 }
 0x1eb   : > { %v497_v0 = vmul.f32 %v496_v62, %v457_v54 }
 0x1ec   : > { %v436_v1 = vsel %vm434_vm1, %v411_v63, %v433_v43  ;;  %v467_v2 = vand.u32 2147483647, %v411_v63 }
 0x1ed   : > { %438 = vst [vmem:[%s749_s20 + $0x8] sm:$0xff] %v436_v1  ;;  %499 = vrot.lane.b32.xlu0 %v497_v0, %s664_s14 }
 0x1ee   : > { %v472_v4 = vsub.f32 %v467_v2, %v470_v3 }
 0x1f0   : > { %v473_v5 = vmax.f32 %v472_v4, 0.0 }
 0x1f2   : > { %v474_v6 = vand.u32 2147483647, %v473_v5  ;;  %v476_v7 = vmul.f32 0.5, %v473_v5 }
 0x1f4   : > { %v477_v8 = vmul.f32 %v476_v7, %v473_v5  ;;  %v625_v9 = vadd.f32 -0.5, %v474_v6  ;;  %vm475_vm4 = vcmp.lt.f32.partialorder %v474_v6, 1.0 }
 0x1f6   : > { %v479_v10 = vsel %vm475_vm4, %v477_v8, %v625_v9 }
 0x1f7   : > { %v480_v11 = vmul.f32 %v479_v10, %v751_v23 }
 0x1f9   : > { %v481_v12 = vsel %vm434_vm1, %v480_v11, 0.0 }
 0x20c   : > { %482 = vadd.xlane.f32.xlu0 %v481_v12 }
 0x25a   : > { %v462_v13 = vpop.permute.xlu1 %461 }
 0x25b   : > { %v464_v14 = vsel %vm434_vm1, %v462_v13, 0.0 }
 0x25c   : > { %465 = vadd.xlane.f32.xlu1 %v464_v14 }
 0x25f   : > { %v500_v15 = vpop.permute.xlu0 %499 }
 0x260   : > { %v502_v16 = vsel %vm434_vm1, %v500_v15, 0.0 }
 0x261   : > { %503 = vadd.xlane.f32.xlu0 %v502_v16 }
 0x299   : > { %v483_v17 = vpop.xlane.xlu0 %482 }
 0x2e9   : > { %v466_v18 = vpop.xlane.xlu1 %465 }
 0x2ea   : > { %v506_v19 = vsel %vm505_vm5, %v466_v18, %v483_v17 }
 0x2ee   : > { %v504_v20 = vpop.xlane.xlu0 %503 }
 0x2ef   : > { %v508_v21 = vsel %vm507_vm6, %v506_v19, %v504_v20 }
 0x2f0   : > { %510 = vst.msk [vmem:[%s276_s24] sm:$0xff] %vm509_vm7, %v508_v21 }
 0x2f1 PF: > { %s17_s21 = sadd.s32 1, %s660_s21  }
 0x2f2   : > { %p14_p4 = scmp.ge.s32.totalorder %s17_s21, 4  }
 0x2f4   :  { %16 = sbr.rel (!%p14_p4) target bundleno = 1 (0x1), region = 85 }

</bundles_post_ra>
